<compile_context>
chip_gen: v7x
topology: tpu7x:2x2x1
jax: 0.10.0
libtpu: 0.0.40
codegen_flags: <defaults>
</compile_context>

<pallas_src>
import functools
import math

import jax
import jax.numpy as jnp
from jax.experimental import pallas as pl
from jax.experimental.pallas import tpu as pltpu

S_SCALE = 64.0                    # CombinedMarginLoss scale s
MARGIN_M2 = 0.5                   # ArcFace additive angular margin m2
COS_M2 = math.cos(MARGIN_M2)      # hoisted immediates (no in-kernel transcendentals)
SIN_M2 = math.sin(MARGIN_M2)
EPS_NORM = 1e-12                  # torch.nn.functional.normalize eps
LOG_P_MIN = math.log(1e-30)       # DistCrossEntropy clamp_min(1e-30).log()


def _partial_fc_kernel(labels_ref, emb_ref, w_ref, loss_ref,
                       embn_ref, m_ref, l_ref, t_ref):
    k = pl.program_id(1)
    nc = pl.num_programs(1)
    tb = emb_ref.shape[0]
    tc = w_ref.shape[0]

    labels = labels_ref[...]                           # (tb, 1) int32, -1 == "not my class"

    # ---- per-batch-tile init: normalize embeddings once, reset online-softmax state ----
    @pl.when(k == 0)
    def _():
        emb = emb_ref[...].astype(jnp.float32)         # (tb, E)
        inv = jax.lax.rsqrt(jnp.maximum(jnp.sum(emb * emb, axis=-1, keepdims=True),
                                        EPS_NORM * EPS_NORM))
        embn_ref[...] = (emb * inv).astype(jnp.bfloat16)
        m_ref[...] = jnp.full(m_ref.shape, -jnp.inf, dtype=m_ref.dtype)
        l_ref[...] = jnp.zeros(l_ref.shape, dtype=l_ref.dtype)
        t_ref[...] = jnp.zeros(t_ref.shape, dtype=t_ref.dtype)

    # ---- normalize this tile of class centers (rows independent -> tiling is safe) ----
    w = w_ref[...].astype(jnp.float32)                 # (tc, E)
    w_inv = jax.lax.rsqrt(jnp.maximum(jnp.sum(w * w, axis=-1, keepdims=True),
                                      EPS_NORM * EPS_NORM))
    w_n = (w * w_inv).astype(jnp.bfloat16)

    # ---- cosine logits on the MXU: bf16 inputs, f32 accumulate ----
    cos = jax.lax.dot_general(embn_ref[...], w_n, (((1,), (1,)), ((), ())),
                              preferred_element_type=jnp.float32)      # (tb, tc)
    cos = jnp.clip(cos, -1.0, 1.0)

    # ---- target mask for THIS class tile (column offset by k*tc) ----
    col = jax.lax.broadcasted_iota(jnp.int32, (tb, tc), 1) + k * tc
    is_target = col == labels                          # label == -1 never matches (col >= 0)
    in_tile = (labels >= k * tc) & (labels < (k + 1) * tc)             # (tb, 1)

    # target cosine per row (only tb values), ArcFace margin applied only there
    tgt_cos = jnp.sum(jnp.where(is_target, cos, 0.0), axis=-1, keepdims=True)   # (tb, 1)
    sin_t = jnp.sqrt(jnp.maximum(1.0 - tgt_cos * tgt_cos, 0.0))
    tgt_margin = (tgt_cos * COS_M2 - sin_t * SIN_M2) * S_SCALE                  # (tb, 1)

    logits = jnp.where(is_target, tgt_margin, cos * S_SCALE)                    # (tb, tc)

    # ---- online softmax update (running max m, running sum-exp l) ----
    m_prev = m_ref[...]
    m_new = jnp.maximum(m_prev, jnp.max(logits, axis=-1, keepdims=True))
    alpha = jnp.exp(m_prev - m_new)
    l_ref[...] = alpha * l_ref[...] + jnp.sum(jnp.exp(logits - m_new),
                                              axis=-1, keepdims=True)
    m_ref[...] = m_new
    t_ref[...] = jnp.where(in_tile, tgt_margin, t_ref[...])

    # ---- finalize: log-sum-exp cross entropy, clamp matches clamp_min(1e-30).log() ----
    @pl.when(k == nc - 1)
    def _():
        log_p = t_ref[...] - m_ref[...] - jnp.log(l_ref[...])
        valid = labels >= 0
        log_p = jnp.where(valid, jnp.maximum(log_p, LOG_P_MIN), LOG_P_MIN)
        loss_ref[...] = -log_p                         # per-row loss (tb, 1)


def _pick_tile(n, candidates):
    for c in candidates:
        if n % c == 0:
            return c
    return n


@functools.partial(jax.jit, static_argnames=("tb", "tc"))
def partial_fc_loss(embeddings, labels, weight, *, tb=None, tc=None):
    """embeddings: (B, E) f32, labels: (B,) int32 (-1 allowed), weight: (C, E) f32."""
    B, E = embeddings.shape
    C, E2 = weight.shape
    assert E == E2
    if tb is None:
        tb = _pick_tile(B, (128, 64, 32, 16, 8))
    if tc is None:
        tc = _pick_tile(C, (2048, 1024, 512, 256, 128))
    assert B % tb == 0 and C % tc == 0
    nb, nc = B // tb, C // tc

    labels2d = labels.reshape(B, 1).astype(jnp.int32)

    cost = pl.CostEstimate(
        flops=2 * B * C * E,
        transcendentals=B * C + B + C,
        bytes_accessed=4 * (B * E + C * E + 2 * B),
    )

    # VMEM budget: double-buffered inputs/outputs + scratch + (tb, tc) intermediates.
    vmem_need = (2 * 4 * (tb * E + tc * E + 2 * tb)   # pipelined in/out buffers (f32)
                 + 2 * tb * E + 4 * 4 * tb            # bf16 emb scratch + (tb,1) state
                 + 6 * 4 * tb * tc)                   # (tb, tc) intermediates headroom
    vmem_limit = int(min(max(2 * vmem_need, 8 << 20), 48 << 20))

    per_row = pl.pallas_call(
        _partial_fc_kernel,
        out_shape=jax.ShapeDtypeStruct((B, 1), jnp.float32),
        grid=(nb, nc),
        in_specs=[
            pl.BlockSpec((tb, 1), lambda i, k: (i, 0)),    # labels (resident across k)
            pl.BlockSpec((tb, E), lambda i, k: (i, 0)),    # embeddings (resident across k)
            pl.BlockSpec((tc, E), lambda i, k: (k, 0)),    # class-center tile (streamed)
        ],
        out_specs=pl.BlockSpec((tb, 1), lambda i, k: (i, 0)),
        scratch_shapes=[
            pltpu.VMEM((tb, E), jnp.bfloat16),             # cached normalized embeddings
            pltpu.VMEM((tb, 1), jnp.float32),              # running max m
            pltpu.VMEM((tb, 1), jnp.float32),              # running sum-exp l
            pltpu.VMEM((tb, 1), jnp.float32),              # target margined logit t
        ],
        compiler_params=pltpu.CompilerParams(
            dimension_semantics=("parallel", "arbitrary"),
            vmem_limit_bytes=vmem_limit,
        ),
        cost_estimate=cost,
    )(labels2d, embeddings, weight)

    return jnp.mean(per_row)


def partial_fc_loss_ref(embeddings, labels, weight):
    """Pure-JAX f32 reference of the same forward pass (single rank, sample_rate=1)."""
    B = embeddings.shape[0]
    C = weight.shape[0]
    labels = labels.reshape(B, 1).astype(jnp.int32)
    emb_n = embeddings / jnp.maximum(
        jnp.linalg.norm(embeddings, axis=-1, keepdims=True), EPS_NORM)
    w_n = weight / jnp.maximum(
        jnp.linalg.norm(weight, axis=-1, keepdims=True), EPS_NORM)
    logits = jnp.clip(emb_n @ w_n.T, -1.0, 1.0)
    col = jnp.arange(C, dtype=jnp.int32)[None, :]
    is_target = (col == labels) & (labels >= 0)
    sin_theta = jnp.sqrt(jnp.maximum(1.0 - logits * logits, 0.0))
    margin = logits * COS_M2 - sin_theta * SIN_M2
    logits = jnp.where(is_target, margin, logits) * S_SCALE
    p = jax.nn.softmax(logits, axis=-1)
    p_target = jnp.sum(jnp.where(is_target, p, 0.0), axis=-1)
    return -jnp.mean(jnp.log(jnp.maximum(p_target, 1e-30)))


if __name__ == "__main__":
    B, E, C = 16, 128, 512   # batch, embedding_size, num_classes (single rank)
    key = jax.random.PRNGKey(0)
    k_emb, k_w, k_lab = jax.random.split(key, 3)

    # Deterministic inputs / parameters (PartialFC init: weight ~ N(0, 0.01)).
    embeddings = jax.random.normal(k_emb, (B, E), dtype=jnp.float32)
    weight = 0.01 * jax.random.normal(k_w, (C, E), dtype=jnp.float32)
    labels = jax.random.randint(k_lab, (B,), 0, C, dtype=jnp.int32)
    labels = labels.at[0].set(-1)   # exercise the "not my class" (-1) path

    # tb=8, tc=128 -> grid (2, 4): exercises batch-parallel axis + class streaming.
    loss = jax.block_until_ready(
        partial_fc_loss(embeddings, labels, weight, tb=8, tc=128))
    loss_ref = jax.block_until_ready(partial_fc_loss_ref(embeddings, labels, weight))

    assert jnp.isfinite(loss), "non-finite loss"
    # bf16 matmul inputs (f32 accumulate) vs f32 reference -> loosened tolerance.
    assert jnp.allclose(loss, loss_ref, rtol=2e-2, atol=5e-2), (loss, loss_ref)
    print("KERNEL_OK")
</pallas_src>

<mosaic_0001>
module attributes {stable_mosaic.version = 11 : i64} {
  func.func @_partial_fc_kernel(%arg0: i32, %arg1: i32, %arg2: memref<8x1xi32, #tpu.memory_space<vmem>>, %arg3: memref<8x128xf32, #tpu.memory_space<vmem>>, %arg4: memref<128x128xf32, #tpu.memory_space<vmem>>, %arg5: memref<8x1xf32, #tpu.memory_space<vmem>>, %arg6: memref<8x128xbf16, #tpu.memory_space<vmem>>, %arg7: memref<8x1xf32, #tpu.memory_space<vmem>>, %arg8: memref<8x1xf32, #tpu.memory_space<vmem>>, %arg9: memref<8x1xf32, #tpu.memory_space<vmem>>) attributes {dimension_semantics = [#tpu.dimension_semantics<parallel>, #tpu.dimension_semantics<arbitrary>], iteration_bounds = array<i64: 2, 4>, scalar_prefetch = 0 : i64, scratch_operands = 4 : i64, tpu.core_type = #tpu.core_type<tc>, window_params = [{transform_indices = @transform_0, window_bounds = array<i64: 8, 1>}, {transform_indices = @transform_1, window_bounds = array<i64: 8, 128>}, {transform_indices = @transform_2, window_bounds = array<i64: 128, 128>}, {transform_indices = @transform_3, window_bounds = array<i64: 8, 1>}]} {
    %c0 = arith.constant 0 : index
    %c0_0 = arith.constant 0 : index
    %0 = vector.load %arg2[%c0, %c0_0] : memref<8x1xi32, #tpu.memory_space<vmem>>, vector<8x1xi32>
    %c0_i32 = arith.constant 0 : i32
    %1 = arith.cmpi eq, %arg1, %c0_i32 : i32
    %2 = arith.extui %1 : i1 to i32
    %c0_i32_1 = arith.constant 0 : i32
    %3 = arith.cmpi ne, %2, %c0_i32_1 : i32
    scf.if %3 {
      %c0_35 = arith.constant 0 : index
      %c0_36 = arith.constant 0 : index
      %78 = vector.load %arg3[%c0_35, %c0_36] : memref<8x128xf32, #tpu.memory_space<vmem>>, vector<8x128xf32>
      %79 = arith.mulf %78, %78 : vector<8x128xf32>
      %cst_37 = arith.constant dense<0.000000e+00> : vector<8xf32>
      %80 = vector.multi_reduction <add>, %79, %cst_37 [1] : vector<8x128xf32> to vector<8xf32>
      %81 = vector.shape_cast %80 : vector<8xf32> to vector<8x1xf32>
      %cst_38 = arith.constant 1.000000e-24 : f32
      %82 = vector.broadcast %cst_38 : f32 to vector<8x1xf32>
      %83 = arith.maximumf %81, %82 : vector<8x1xf32>
      %84 = math.rsqrt %83 : vector<8x1xf32>
      %85 = vector.broadcast %84 : vector<8x1xf32> to vector<8x128xf32>
      %86 = arith.mulf %78, %85 : vector<8x128xf32>
      %87 = arith.truncf %86 : vector<8x128xf32> to vector<8x128xbf16>
      %c0_39 = arith.constant 0 : index
      %c0_40 = arith.constant 0 : index
      %88 = vector.load %arg6[%c0_39, %c0_40] : memref<8x128xbf16, #tpu.memory_space<vmem>>, vector<8x128xbf16>
      tpu.vector_store %arg6[%c0_39, %c0_40], %87 {strides = array<i32>} : memref<8x128xbf16, #tpu.memory_space<vmem>>, vector<8x128xbf16>,
      %cst_41 = arith.constant 0xFF800000 : f32
      %89 = vector.broadcast %cst_41 : f32 to vector<8x1xf32>
      %c0_42 = arith.constant 0 : index
      %c0_43 = arith.constant 0 : index
      %90 = vector.load %arg7[%c0_42, %c0_43] : memref<8x1xf32, #tpu.memory_space<vmem>>, vector<8x1xf32>
      tpu.vector_store %arg7[%c0_42, %c0_43], %89 {strides = array<i32>} : memref<8x1xf32, #tpu.memory_space<vmem>>, vector<8x1xf32>,
      %cst_44 = arith.constant 0.000000e+00 : f32
      %91 = vector.broadcast %cst_44 : f32 to vector<8x1xf32>
      %c0_45 = arith.constant 0 : index
      %c0_46 = arith.constant 0 : index
      %92 = vector.load %arg8[%c0_45, %c0_46] : memref<8x1xf32, #tpu.memory_space<vmem>>, vector<8x1xf32>
      tpu.vector_store %arg8[%c0_45, %c0_46], %91 {strides = array<i32>} : memref<8x1xf32, #tpu.memory_space<vmem>>, vector<8x1xf32>,
      %cst_47 = arith.constant 0.000000e+00 : f32
      %93 = vector.broadcast %cst_47 : f32 to vector<8x1xf32>
      %c0_48 = arith.constant 0 : index
      %c0_49 = arith.constant 0 : index
      %94 = vector.load %arg9[%c0_48, %c0_49] : memref<8x1xf32, #tpu.memory_space<vmem>>, vector<8x1xf32>
      tpu.vector_store %arg9[%c0_48, %c0_49], %93 {strides = array<i32>} : memref<8x1xf32, #tpu.memory_space<vmem>>, vector<8x1xf32>,
    } else {
    }
    %c0_2 = arith.constant 0 : index
    %c0_3 = arith.constant 0 : index
    %4 = vector.load %arg4[%c0_2, %c0_3] : memref<128x128xf32, #tpu.memory_space<vmem>>, vector<128x128xf32>
    %5 = arith.mulf %4, %4 : vector<128x128xf32>
    %cst = arith.constant dense<0.000000e+00> : vector<128xf32>
    %6 = vector.multi_reduction <add>, %5, %cst [1] : vector<128x128xf32> to vector<128xf32>
    %7 = vector.shape_cast %6 : vector<128xf32> to vector<128x1xf32>
    %cst_4 = arith.constant 1.000000e-24 : f32
    %8 = vector.broadcast %cst_4 : f32 to vector<128x1xf32>
    %9 = arith.maximumf %7, %8 : vector<128x1xf32>
    %10 = math.rsqrt %9 : vector<128x1xf32>
    %11 = vector.broadcast %10 : vector<128x1xf32> to vector<128x128xf32>
    %12 = arith.mulf %4, %11 : vector<128x128xf32>
    %13 = arith.truncf %12 : vector<128x128xf32> to vector<128x128xbf16>
    %c0_5 = arith.constant 0 : index
    %c0_6 = arith.constant 0 : index
    %14 = vector.load %arg6[%c0_5, %c0_6] : memref<8x128xbf16, #tpu.memory_space<vmem>>, vector<8x128xbf16>
    %cst_7 = arith.constant dense<0.000000e+00> : vector<8x128xf32>
    %15 = tpu.matmul %14, %13, %cst_7 {dimension_numbers = #tpu.dot_dimension_numbers<[1], [1], [0], [0], [0, 0, 1, 0], [], []>} : vector<8x128xbf16>, vector<128x128xbf16>, vector<8x128xf32> -> vector<8x128xf32>
    %cst_8 = arith.constant -1.000000e+00 : f32
    %cst_9 = arith.constant 1.000000e+00 : f32
    %16 = vector.broadcast %cst_8 : f32 to vector<8x128xf32>
    %17 = arith.maximumf %16, %15 : vector<8x128xf32>
    %18 = vector.broadcast %cst_9 : f32 to vector<8x128xf32>
    %19 = arith.minimumf %18, %17 : vector<8x128xf32>
    %20 = tpu.iota {dimensions = array<i32: 1>} : vector<8x128xi32>
    %c128_i32 = arith.constant 128 : i32
    %21 = arith.muli %arg1, %c128_i32 : i32
    %22 = vector.broadcast %21 : i32 to vector<8x128xi32>
    %23 = arith.addi %20, %22 : vector<8x128xi32>
    %24 = vector.broadcast %0 : vector<8x1xi32> to vector<8x128xi32>
    %25 = arith.cmpi eq, %23, %24 : vector<8x128xi32>
    %c128_i32_10 = arith.constant 128 : i32
    %26 = arith.muli %arg1, %c128_i32_10 : i32
    %27 = vector.broadcast %26 : i32 to vector<8x1xi32>
    %28 = arith.cmpi sge, %0, %27 : vector<8x1xi32>
    %c1_i32 = arith.constant 1 : i32
    %29 = arith.addi %arg1, %c1_i32 : i32
    %c128_i32_11 = arith.constant 128 : i32
    %30 = arith.muli %29, %c128_i32_11 : i32
    %31 = vector.broadcast %30 : i32 to vector<8x1xi32>
    %32 = arith.cmpi slt, %0, %31 : vector<8x1xi32>
    %33 = arith.andi %28, %32 : vector<8x1xi1>
    %cst_12 = arith.constant 0.000000e+00 : f32
    %34 = vector.broadcast %cst_12 : f32 to vector<8x128xf32>
    %35 = arith.select %25, %19, %34 : vector<8x128xi1>, vector<8x128xf32>
    %cst_13 = arith.constant dense<0.000000e+00> : vector<8xf32>
    %36 = vector.multi_reduction <add>, %35, %cst_13 [1] : vector<8x128xf32> to vector<8xf32>
    %37 = vector.shape_cast %36 : vector<8xf32> to vector<8x1xf32>
    %38 = arith.mulf %37, %37 : vector<8x1xf32>
    %cst_14 = arith.constant 1.000000e+00 : f32
    %39 = vector.broadcast %cst_14 : f32 to vector<8x1xf32>
    %40 = arith.subf %39, %38 : vector<8x1xf32>
    %cst_15 = arith.constant 0.000000e+00 : f32
    %41 = vector.broadcast %cst_15 : f32 to vector<8x1xf32>
    %42 = arith.maximumf %40, %41 : vector<8x1xf32>
    %43 = math.sqrt %42 : vector<8x1xf32>
    %cst_16 = arith.constant 0.87758255 : f32
    %44 = vector.broadcast %cst_16 : f32 to vector<8x1xf32>
    %45 = arith.mulf %37, %44 : vector<8x1xf32>
    %cst_17 = arith.constant 0.47942555 : f32
    %46 = vector.broadcast %cst_17 : f32 to vector<8x1xf32>
    %47 = arith.mulf %43, %46 : vector<8x1xf32>
    %48 = arith.subf %45, %47 : vector<8x1xf32>
    %cst_18 = arith.constant 6.400000e+01 : f32
    %49 = vector.broadcast %cst_18 : f32 to vector<8x1xf32>
    %50 = arith.mulf %48, %49 : vector<8x1xf32>
    %cst_19 = arith.constant 6.400000e+01 : f32
    %51 = vector.broadcast %cst_19 : f32 to vector<8x128xf32>
    %52 = arith.mulf %19, %51 : vector<8x128xf32>
    %53 = vector.shape_cast %50 : vector<8x1xf32> to vector<8x1xf32>
    %54 = vector.broadcast %53 : vector<8x1xf32> to vector<8x128xf32>
    %55 = arith.select %25, %54, %52 : vector<8x128xi1>, vector<8x128xf32>
    %c0_20 = arith.constant 0 : index
    %c0_21 = arith.constant 0 : index
    %56 = vector.load %arg7[%c0_20, %c0_21] : memref<8x1xf32, #tpu.memory_space<vmem>>, vector<8x1xf32>
    %cst_22 = arith.constant dense<0xFF800000> : vector<8xf32>
    %57 = vector.multi_reduction <maximumf>, %55, %cst_22 [1] : vector<8x128xf32> to vector<8xf32>
    %58 = vector.shape_cast %57 : vector<8xf32> to vector<8x1xf32>
    %59 = arith.maximumf %56, %58 : vector<8x1xf32>
    %60 = arith.subf %56, %59 : vector<8x1xf32>
    %61 = math.exp %60 : vector<8x1xf32>
    %c0_23 = arith.constant 0 : index
    %c0_24 = arith.constant 0 : index
    %62 = vector.load %arg8[%c0_23, %c0_24] : memref<8x1xf32, #tpu.memory_space<vmem>>, vector<8x1xf32>
    %63 = arith.mulf %61, %62 : vector<8x1xf32>
    %64 = vector.broadcast %59 : vector<8x1xf32> to vector<8x128xf32>
    %65 = arith.subf %55, %64 : vector<8x128xf32>
    %66 = math.exp %65 : vector<8x128xf32>
    %cst_25 = arith.constant dense<0.000000e+00> : vector<8xf32>
    %67 = vector.multi_reduction <add>, %66, %cst_25 [1] : vector<8x128xf32> to vector<8xf32>
    %68 = vector.shape_cast %67 : vector<8xf32> to vector<8x1xf32>
    %69 = arith.addf %63, %68 : vector<8x1xf32>
    %c0_26 = arith.constant 0 : index
    %c0_27 = arith.constant 0 : index
    %70 = vector.load %arg8[%c0_26, %c0_27] : memref<8x1xf32, #tpu.memory_space<vmem>>, vector<8x1xf32>
    tpu.vector_store %arg8[%c0_26, %c0_27], %69 {strides = array<i32>} : memref<8x1xf32, #tpu.memory_space<vmem>>, vector<8x1xf32>,
    %c0_28 = arith.constant 0 : index
    %c0_29 = arith.constant 0 : index
    %71 = vector.load %arg7[%c0_28, %c0_29] : memref<8x1xf32, #tpu.memory_space<vmem>>, vector<8x1xf32>
    tpu.vector_store %arg7[%c0_28, %c0_29], %59 {strides = array<i32>} : memref<8x1xf32, #tpu.memory_space<vmem>>, vector<8x1xf32>,
    %c0_30 = arith.constant 0 : index
    %c0_31 = arith.constant 0 : index
    %72 = vector.load %arg9[%c0_30, %c0_31] : memref<8x1xf32, #tpu.memory_space<vmem>>, vector<8x1xf32>
    %73 = arith.select %33, %50, %72 : vector<8x1xi1>, vector<8x1xf32>
    %c0_32 = arith.constant 0 : index
    %c0_33 = arith.constant 0 : index
    %74 = vector.load %arg9[%c0_32, %c0_33] : memref<8x1xf32, #tpu.memory_space<vmem>>, vector<8x1xf32>
    tpu.vector_store %arg9[%c0_32, %c0_33], %73 {strides = array<i32>} : memref<8x1xf32, #tpu.memory_space<vmem>>, vector<8x1xf32>,
    %c3_i32 = arith.constant 3 : i32
    %75 = arith.cmpi eq, %arg1, %c3_i32 : i32
    %76 = arith.extui %75 : i1 to i32
    %c0_i32_34 = arith.constant 0 : i32
    %77 = arith.cmpi ne, %76, %c0_i32_34 : i32
    scf.if %77 {
      %c0_35 = arith.constant 0 : index
      %c0_36 = arith.constant 0 : index
      %78 = vector.load %arg9[%c0_35, %c0_36] : memref<8x1xf32, #tpu.memory_space<vmem>>, vector<8x1xf32>
      %c0_37 = arith.constant 0 : index
      %c0_38 = arith.constant 0 : index
      %79 = vector.load %arg7[%c0_37, %c0_38] : memref<8x1xf32, #tpu.memory_space<vmem>>, vector<8x1xf32>
      %80 = arith.subf %78, %79 : vector<8x1xf32>
      %c0_39 = arith.constant 0 : index
      %c0_40 = arith.constant 0 : index
      %81 = vector.load %arg8[%c0_39, %c0_40] : memref<8x1xf32, #tpu.memory_space<vmem>>, vector<8x1xf32>
      %82 = math.log %81 : vector<8x1xf32>
      %83 = arith.subf %80, %82 : vector<8x1xf32>
      %c0_i32_41 = arith.constant 0 : i32
      %84 = vector.broadcast %c0_i32_41 : i32 to vector<8x1xi32>
      %85 = arith.cmpi sge, %0, %84 : vector<8x1xi32>
      %cst_42 = arith.constant -69.0775528 : f32
      %86 = vector.broadcast %cst_42 : f32 to vector<8x1xf32>
      %87 = arith.maximumf %83, %86 : vector<8x1xf32>
      %cst_43 = arith.constant -69.0775528 : f32
      %88 = vector.broadcast %cst_43 : f32 to vector<8x1xf32>
      %89 = arith.select %85, %87, %88 : vector<8x1xi1>, vector<8x1xf32>
      %cst_44 = arith.constant 0.000000e+00 : f32
      %90 = vector.broadcast %cst_44 : f32 to vector<8x1xf32>
      %91 = arith.subf %90, %89 : vector<8x1xf32>
      %c0_45 = arith.constant 0 : index
      %c0_46 = arith.constant 0 : index
      %92 = vector.load %arg5[%c0_45, %c0_46] : memref<8x1xf32, #tpu.memory_space<vmem>>, vector<8x1xf32>
      tpu.vector_store %arg5[%c0_45, %c0_46], %91 {strides = array<i32>} : memref<8x1xf32, #tpu.memory_space<vmem>>, vector<8x1xf32>,
    } else {
    }
    return
  }
  func.func @transform_0(%arg0: i32, %arg1: i32) -> (i32, i32) {
    %c0_i32 = arith.constant 0 : i32
    %c0_i32_0 = arith.constant 0 : i32
    return %arg0, %c0_i32 : i32, i32
  }
  func.func @transform_1(%arg0: i32, %arg1: i32) -> (i32, i32) {
    %c0_i32 = arith.constant 0 : i32
    %c0_i32_0 = arith.constant 0 : i32
    return %arg0, %c0_i32 : i32, i32
  }
  func.func @transform_2(%arg0: i32, %arg1: i32) -> (i32, i32) {
    %c0_i32 = arith.constant 0 : i32
    %c0_i32_0 = arith.constant 0 : i32
    return %arg1, %c0_i32 : i32, i32
  }
  func.func @transform_3(%arg0: i32, %arg1: i32) -> (i32, i32) {
    %c0_i32 = arith.constant 0 : i32
    %c0_i32_0 = arith.constant 0 : i32
    return %arg0, %c0_i32 : i32, i32
  }
}

</mosaic_0001>

<bundles_post_ra>
// kernel: partial_fc_loss.1
= control target key start
LH: loop header
LB: loop body
LE: loop exit
PB: predicated region body
PF: predicated region fallthrough
CT: control target
= control target key end

     0   :  { %8 = vsyncpa [#allocation7], 0  ;;  %s1181_s0 = inlined_call_operand.vmem [shape: s32[16,1], index: 0, kind: input, shape index: {}]   ;;  %s1182_s1 = inlined_call_operand.vmem [shape: f32[16,128], index: 1, kind: input, shape index: {}]   ;;  %s1183_s2 = inlined_call_operand.hbm [shape: f32[512,128], index: 2, kind: input, shape index: {}]   ;;  %s1184_s3 = inlined_call_operand.vmem [shape: f32[16,1], index: 3, kind: output, shape index: {}]  }
   0x1   :  { %10 = vsyncpa [#allocation7 + $0x1], 0  ;;  %s893_s12 = smov 0   ;;  %s895_s13 = smov 0  }
   0x2   :  { %s897_s14 = smov 0   ;;  %s899_s15 = smov 0  }
   0x3   :  { %s901_s16 = smov 0   ;;  %s903_s17 = smov 0  }
   0x4   :  { %s905_s18 = smov 0   ;;  %s907_s19 = smov 0  }
   0x5 LB: > { %s594_s20 = sadd.s32 4294967295, %s863_s19   ;;  %s25_s21 = sadd.s32 1, %s855_s17  ;;  %s863_s19 = sphi %s907_s19, %s16_s19   ;;  %s859_s18 = sphi %s905_s18, %s1196_s18   ;;  %s855_s17 = sphi %s903_s17, %s1195_s17   ;;  %s851_s16 = sphi %s901_s16, %s1194_s16   ;;  %s847_s15 = sphi %s899_s15, %s1193_s15   ;;  %s843_s14 = sphi %s897_s14, %s1192_s14   ;;  %s839_s13 = sphi %s895_s13, %s1191_s13   ;;  %s835_s12 = sphi %s893_s12, %s1190_s12  }
   0x6   : > { %p26_p0 = scmp.ge.s32.totalorder %s25_s21, 4  ;;  %s28_s22 = sadd.s32 1, %s859_s18 }
   0x7   : > { %s87_s23 = sadd.s32 1, %s843_s14  ;;  %p94_p1 = scmp.ne.s32.totalorder %s843_s14, %s839_s13 }
   0x8   : > { %s1198_s21 = smov (%p26_p0, %s25_s21), 0  ;;  %s1200_s22 = smov (!%p26_p0, %s28_s22), %s859_s18 }
   0x9   : > { %s84_s24 = ssub.s32 %s855_s17, %s1198_s21  ;;  %p95_p2 = scmp.eq.s32.totalorder %s863_s19, 0 }
   0xa   : > { %p30_p3 = scmp.ge.s32.totalorder %s1200_s22, 2  ;;  %p85_p4 = scmp.eq.s32.totalorder %s84_s24, 0 }
   0xb   : > { %p943_p5 = por %p95_p2, %p94_p1  ;;  %p100_p6 = scmp.ne.s32.totalorder %s839_s13, %s835_s12 }
   0xc   : > { %s1202_s22 = smov (%p30_p3, %s1200_s22), 0  ;;  %p101_p7 = scmp.eq.s32.totalorder %s594_s20, 0 }
   0xd   : > { %s951_s26 = scalar_select %p85_p4, %s843_s14, %s87_s23  }
   0xe   : > { %p651_p8 = scmp.lt.s32.totalorder %s863_s19, 8  ;;  %s164_s27 = sand.u32 1, %s843_s14  }
   0xf   : > { %p955_p9 = por %p101_p7, %p100_p6  ;;  %s598_s29 = sshll.u32 %s164_s27, 7 }
  0x10   : > { %s613_s30 = sshll.u32 %s855_s17, 11  ;;  %s168_s7 = scalar_lea.vmem [#allocation6], %s598_s29 }
  0x11   : > { %s963_s6 = scalar_lea.hbm %s1183_s2, %s613_s30  ;;  %s175_s8 = sshll.u32 %s168_s7, 4  ;;  %s971_s8 = int_to_ptr.vmem [resolvable:$true] %s175_s8 }
  0x12   : > { %p967_p10 = pnand %p651_p8, %p943_p5  ;;  %s973_s10 = scalar_lea.sflag [#allocation7], %s164_s27 }
  0x13   : > { %s767_s11 = scalar_lea.hbm %s963_s6, 2048  ;;  %s772_s23 = scalar_lea.hbm %s1183_s2, 8192 }
  0x14   : > { %p768_p11 = scmp.ne.s32.totalorder %s963_s6, %s767_s11  ;;  %p769_p12 = pneg %p967_p10 }
  0x15   : > { %p773_p1 = scmp.lt.u32.totalorder %s963_s6, %s1183_s2  ;;  %p774_p2 = scmp.lt.u32.totalorder %s772_s23, %s767_s11 }
  0x16   : > { %p770_p13 = pnand %p769_p12, %p768_p11  ;;  %p776_p4 = scmp.lt.u32.totalorder %s767_s11, %s963_s6 }
  0x17   : > { %p775_p3 = por %p774_p2, %p773_p1 }
  0x18   : > { %p771_p0 = pneg %p770_p13 }
  0x19   : > { %p777_p5 = por %p776_p4, %p775_p3 }
  0x1b   : > { %p778_p6 = pnand %p777_p5, %p771_p0 }
  0x1d   : > { %781 = shalt.err (!%p778_p6)
}
  0x1e   : > { %s782_s27 = scalar_lea.vmem %s971_s8, 2048  ;;  %s865_s29 = smov [#allocation6]  }
  0x1f   : > { %p783_p7 = scmp.ne.s32.totalorder %s971_s8, %s782_s27  ;;  %s787_s30 = sshll.u32 %s865_s29, 4  ;;  %s788_s30 = int_to_ptr.vmem [resolvable:$false] %s787_s30 }
  0x20   : > { %s789_s4 = scalar_lea.vmem %s788_s30, 4096  ;;  %p790_p13 = scmp.lt.s32.totalorder %s971_s8, %s788_s30 }
  0x21   : > { %p785_p8 = pnand %p783_p7, %p769_p12  ;;  %p791_p1 = scmp.lt.s32.totalorder %s789_s4, %s782_s27 }
  0x23   : > { %p786_p11 = pneg %p785_p8  ;;  %p792_p2 = por %p791_p1, %p790_p13 }
  0x25   : > { %p793_p3 = pnand %p792_p2, %p786_p11 }
  0x27   : > { %796 = shalt.err (!%p793_p3)
}
  0x28   : > { %s866_s5 = smov 128   ;;  %s867_s7 = smov 8  }
  0x29   : > { %650 = dma.hbm_to_vmem [thread:$0]  (!%p967_p10), %s963_s6, 2048, %s971_s8, %s973_s10, %s866_s5, %s866_s5, %s867_s7  }
  0x2a   : > { %p601_p12 = scmp.ge.s32.totalorder %s863_s19, 1  ;;  %p183_p0 = scmp.lt.s32.totalorder %s863_s19, 9 }
  0x2c   : > { %p184_p4 = pnand %p601_p12, %p183_p0 }
  0x2d   : > { %s189_s11 = sand.u32 (!%p184_p4), 1, %s839_s13  }
  0x2e   : > { %187 = sbr.rel (%p184_p4) target bundleno = 1297 (0x511), region = 32  ;;  %s602_s12 = sshll.u32 (!%p184_p4), %s189_s11, 7 }
  0x2f   : > { %s190_s20 = scalar_lea.sflag (!%p184_p4), [#allocation7], %s189_s11  ;;  %s1004_s23 = scalar_lea.vmem (!%p184_p4), [#allocation6], %s602_s12 }
  0x35   : > { %830 = dma.done.wait (%p955_p9), %s190_s20, 2048  }
  0x36   : > { %832 = vsyncadd (%p955_p9), %s190_s20, 4294965248  ;;  %p223_p5 = scmp.lt.s32.totalorder %s851_s16, 1  ;;  %p606_p9 = scmp.ne.s32.totalorder %s847_s15, 0 }
  0x37   : > { %vm251_vm0 = vcmask (!%p606_p9), 7168   ;;  %v868_v3 = vmov (!%p606_p9), -inf   ;;  %v869_v4 = vmov (!%p606_p9), 0.0  }
  0x38   : > { %s1204_s16 = smov (!%p223_p5, %s851_s16), 1  ;;  %241 = sbr.rel (%p606_p9) target bundleno = 223 (0xdf), region = 40 }
  0x39   : > { %s1012_s6 = sshll.u32 %s1204_s16, 3  ;;  %252 = vst.msk [vmem:[#allocation3] sm:$0xff] (!%p606_p9), %vm251_vm0, %v868_v3  ;;  %253 = vst.msk [vmem:[#allocation4] sm:$0xff] (!%p606_p9), %vm251_vm0, %v869_v4 }
  0x3a   : > { %s226_s10 = scalar_lea.vmem %s1181_s0, %s1012_s6  ;;  %s230_s27 = scalar_lea.vmem %s1182_s1, %s1012_s6  ;;  %254 = vst.msk [vmem:[#allocation5] sm:$0xff] (!%p606_p9), %vm251_vm0, %v869_v4 }
  0x3b   : > { %s235_s30 = scalar_lea.vmem %s1184_s3, %s1012_s6  ;;  %v1026_v0 = vld [vmem:[%s226_s10] sm:$0xff] }
  0x3c   : > { %v242_v1 = vld [vmem:[%s230_s27] sm:$0xff] (!%p606_p9) }
  0x3d   : > { %v243_v2 = vmul.f32 (!%p606_p9), %v242_v1, %v242_v1 }
  0x3f   : > { %244 = vadd.xlane.f32.xlu0 %v243_v2 }
  0xcc   : > { %v245_v5 = vpop.xlane.xlu0 %244 }
  0xcd   : > { %v246_v6 = vmax.f32 %v245_v5, 1e-24 }
  0xcf   : > { %723 = vrsqrt.f32 %v246_v6 }
  0xd9   : > { %v724_v7 = vpop.eup %723 }
  0xda   : > { %v248_v8 = vmul.f32 %v724_v7, %v242_v1 }
  0xdc   : > { %v249_v9 = vpack.c.bf16 %v248_v8, %v248_v8 }
  0xde   : > { %250 = vst [vmem:[#allocation2] sm:$0xf] %v249_v9 }
  0xdf PF: > { %v1030_v10 = vld [vmem:[%s1004_s23] sm:$0xff]  ;;  %v1033_v11 = vld [vmem:[%s1004_s23 + $0x10] sm:$0xff]  ;;  %v1036_v12 = vld [vmem:[%s1004_s23 + $0x8] sm:$0xff]  ;;  %v870_v42 = vmov 0.0   ;;  %vm871_vm1 = vmmov 0   ;;  %v872_v43 = vmov 0  }
  0xe0   : > { %v271_v13 = vmul.f32 %v1030_v10, %v1030_v10  ;;  %v273_v14 = vmul.f32 %v1033_v11, %v1033_v11  ;;  %v1043_v15 = vld [vmem:[%s1004_s23 + $0x18] sm:$0xff]  ;;  %v272_v16 = vmul.f32 %v1036_v12, %v1036_v12  ;;  %v1050_v18 = vld [vmem:[%s1004_s23 + $0x28] sm:$0xff]  ;;  %v1053_v19 = vld [vmem:[%s1004_s23 + $0x20] sm:$0xff]  ;;  %625 = vmatprep.subr.bf16.mxu0 %v870_v42  ;;  %641 = vmatprep.mubr.msk.bf16.mxu0 %vm871_vm1, %v870_v42  ;;  %s608_s16 = sshll.u32 %s847_s15, 7  ;;  %vm472_vm8 = vcmask 7168   ;;  %p610_p10 = scmp.ne.s32.totalorder %s847_s15, 3 }
  0xe1   : > { %v274_v17 = vmul.f32 %v1043_v15, %v1043_v15  ;;  %v276_v20 = vmul.f32 %v1050_v18, %v1050_v18  ;;  %v275_v21 = vmul.f32 %v1053_v19, %v1053_v19  ;;  %v1060_v22 = vld [vmem:[%s1004_s23 + $0x38] sm:$0xff]  ;;  %v1063_v23 = vld [vmem:[%s1004_s23 + $0x30] sm:$0xff]  ;;  %v1070_v26 = vld [vmem:[%s1004_s23 + $0x48] sm:$0xff]  ;;  %725 = vset.pattern.permute.xlu0 %v872_v43  ;;  %726 = vset.pattern.permute.xlu1 %v872_v43  ;;  %s615_s4 = sadd.s32 128, %s608_s16  ;;  %vm489_vm9 = vcmp.ge.s32.totalorder (!%p610_p10), %v1026_v0, 0 }
  0xe2   : > { %287 = vadd.xlane.f32.xlu0 %v271_v13  ;;  %291 = vadd.xlane.f32.xlu1 %v273_v14  ;;  %v278_v24 = vmul.f32 %v1060_v22, %v1060_v22  ;;  %v277_v25 = vmul.f32 %v1063_v23, %v1063_v23  ;;  %v1073_v27 = vld [vmem:[%s1004_s23 + $0x40] sm:$0xff]  ;;  %v280_v28 = vmul.f32 %v1070_v26, %v1070_v26  ;;  %v1080_v30 = vld [vmem:[%s1004_s23 + $0x58] sm:$0xff]  ;;  %v1083_v31 = vld [vmem:[%s1004_s23 + $0x50] sm:$0xff] }
  0xe3   : > { %v279_v29 = vmul.f32 %v1073_v27, %v1073_v27  ;;  %v282_v32 = vmul.f32 %v1080_v30, %v1080_v30  ;;  %v281_v33 = vmul.f32 %v1083_v31, %v1083_v31  ;;  %v1090_v34 = vld [vmem:[%s1004_s23 + $0x68] sm:$0xff]  ;;  %v1093_v35 = vld [vmem:[%s1004_s23 + $0x60] sm:$0xff]  ;;  %v1100_v38 = vld [vmem:[%s1004_s23 + $0x78] sm:$0xff] }
  0xe4   : > { %v284_v36 = vmul.f32 %v1090_v34, %v1090_v34  ;;  %v283_v37 = vmul.f32 %v1093_v35, %v1093_v35  ;;  %v1103_v39 = vld [vmem:[%s1004_s23 + $0x70] sm:$0xff]  ;;  %v286_v40 = vmul.f32 %v1100_v38, %v1100_v38 }
  0xe5   : > { %v285_v41 = vmul.f32 %v1103_v39, %v1103_v39 }
  0xe6   : > { %289 = vadd.xlane.f32.xlu0 %v272_v16  ;;  %293 = vadd.xlane.f32.xlu1 %v274_v17 }
  0xea   : > { %297 = vadd.xlane.f32.xlu1 %v276_v20  ;;  %295 = vadd.xlane.f32.xlu0 %v275_v21 }
  0xee   : > { %301 = vadd.xlane.f32.xlu1 %v278_v24  ;;  %299 = vadd.xlane.f32.xlu0 %v277_v25 }
  0xf2   : > { %305 = vadd.xlane.f32.xlu1 %v280_v28  ;;  %303 = vadd.xlane.f32.xlu0 %v279_v29 }
  0xf6   : > { %309 = vadd.xlane.f32.xlu1 %v282_v32  ;;  %307 = vadd.xlane.f32.xlu0 %v281_v33 }
  0xfa   : > { %313 = vadd.xlane.f32.xlu1 %v284_v36  ;;  %311 = vadd.xlane.f32.xlu0 %v283_v37 }
  0xfe   : > { %317 = vadd.xlane.f32.xlu1 %v286_v40  ;;  %315 = vadd.xlane.f32.xlu0 %v285_v41 }
 0x114   : > { %424 = vperm.xlu0 %725, %v1026_v0  }
 0x16f   : > { %v288_v44 = vpop.xlane.xlu0 %287  ;;  %v292_v45 = vpop.xlane.xlu1 %291 }
 0x170   : > { %v319_v46 = vmax.f32 %v288_v44, 1e-24  ;;  %v321_v50 = vmax.f32 %v292_v45, 1e-24 }
 0x172   : > { %727 = vrsqrt.f32 %v319_v46 }
 0x173   : > { %v290_v47 = vpop.xlane.xlu0 %289  ;;  %v294_v48 = vpop.xlane.xlu1 %293 }
 0x174   : > { %v320_v49 = vmax.f32 %v290_v47, 1e-24  ;;  %v322_v51 = vmax.f32 %v294_v48, 1e-24 }
 0x176   : > { %729 = vrsqrt.f32 %v320_v49 }
 0x177   : > { %v298_v52 = vpop.xlane.xlu1 %297  ;;  %731 = vrsqrt.f32 %v321_v50  ;;  %v296_v53 = vpop.xlane.xlu0 %295 }
 0x178   : > { %733 = vrsqrt.f32 %v322_v51  ;;  %v324_v54 = vmax.f32 %v298_v52, 1e-24  ;;  %v323_v55 = vmax.f32 %v296_v53, 1e-24 }
 0x17a   : > { %735 = vrsqrt.f32 %v324_v54 }
 0x17b   : > { %737 = vrsqrt.f32 %v323_v55  ;;  %v302_v58 = vpop.xlane.xlu1 %301  ;;  %v300_v61 = vpop.xlane.xlu0 %299 }
 0x17c   : > { %v728_v56 = vpop.eup %727  ;;  %v326_v1 = vmax.f32 %v302_v58, 1e-24  ;;  %v325_v3 = vmax.f32 %v300_v61, 1e-24  ;;  %v375_v58 = vld [vmem:[#allocation2] sm:$0xf] }
 0x17d   : > { %v351_v59 = vmul.f32 %v728_v56, %v1030_v10 }
 0x17e   : > { %739 = vrsqrt.f32 %v326_v1 }
 0x17f   : > { %741 = vrsqrt.f32 %v325_v3  ;;  %v306_v6 = vpop.xlane.xlu1 %305  ;;  %v304_v8 = vpop.xlane.xlu0 %303 }
 0x180   : > { %v730_v57 = vpop.eup %729  ;;  %v327_v13 = vmax.f32 %v304_v8, 1e-24 }
 0x181   : > { %v352_v60 = vmul.f32 %v730_v57, %v1036_v12  ;;  %v732_v62 = vpop.eup %731  ;;  %v328_v12 = vmax.f32 %v306_v6, 1e-24 }
 0x182   : > { %v734_v2 = vpop.eup %733  ;;  %v353_v4 = vmul.f32 %v732_v62, %v1033_v11 }
 0x183   : > { %v367_v63 = vpack.c.bf16 %v352_v60, %v351_v59  ;;  %v354_v5 = vmul.f32 %v734_v2, %v1043_v15  ;;  %743 = vrsqrt.f32 %v328_v12  ;;  %v310_v11 = vpop.xlane.xlu1 %309  ;;  %v308_v20 = vpop.xlane.xlu0 %307 }
 0x184   : > { %v736_v7 = vpop.eup %735  ;;  %745 = vrsqrt.f32 %v327_v13  ;;  %v330_v24 = vmax.f32 %v310_v11, 1e-24  ;;  %v329_v25 = vmax.f32 %v308_v20, 1e-24 }
 0x185   : > { %626 = vmatpush3.bf16.xpose.msra.mxu0 %v367_v63  ;;  %v738_v9 = vpop.eup %737  ;;  %v368_v10 = vpack.c.bf16 %v354_v5, %v353_v4  ;;  %v356_v16 = vmul.f32 %v736_v7, %v1050_v18 }
 0x186   : > { %627 = vmatprep.subr.bf16.mxu0 %v870_v42  ;;  %v355_v14 = vmul.f32 %v738_v9, %v1053_v19  ;;  %747 = vrsqrt.f32 %v330_v24 }
 0x187   : > { %749 = vrsqrt.f32 %v329_v25  ;;  %v314_v18 = vpop.xlane.xlu1 %313  ;;  %v312_v33 = vpop.xlane.xlu0 %311  ;;  %v452_v25 = vld [vmem:[#allocation3] sm:$0xff] }
 0x188   : > { %v740_v17 = vpop.eup %739  ;;  %v369_v15 = vpack.c.bf16 %v356_v16, %v355_v14  ;;  %v332_v37 = vmax.f32 %v314_v18, 1e-24  ;;  %v331_v40 = vmax.f32 %v312_v33, 1e-24 }
 0x189   : > { %v742_v21 = vpop.eup %741  ;;  %v358_v29 = vmul.f32 %v740_v17, %v1060_v22  ;;  %v475_v17 = vld [vmem:[#allocation5] sm:$0xff] }
 0x18a   : > { %v357_v28 = vmul.f32 %v742_v21, %v1063_v23  ;;  %751 = vrsqrt.f32 %v332_v37 }
 0x18b   : > { %753 = vrsqrt.f32 %v331_v40  ;;  %v318_v22 = vpop.xlane.xlu1 %317  ;;  %v316_v45 = vpop.xlane.xlu0 %315 }
 0x18c   : > { %v370_v32 = vpack.c.bf16 %v358_v29, %v357_v28  ;;  %v334_v47 = vmax.f32 %v318_v22, 1e-24  ;;  %v333_v48 = vmax.f32 %v316_v45, 1e-24 }
 0x18d   : > { %628 = vmatpush3.bf16.xpose.msra.mxu0 %v368_v10  ;;  %v744_v19 = vpop.eup %743 }
 0x18e   : > { %629 = vmatprep.subr.bf16.mxu0 %v870_v42  ;;  %v746_v36 = vpop.eup %745  ;;  %v360_v43 = vmul.f32 %v744_v19, %v1070_v26  ;;  %755 = vrsqrt.f32 %v334_v47 }
 0x18f   : > { %v359_v41 = vmul.f32 %v746_v36, %v1073_v27  ;;  %757 = vrsqrt.f32 %v333_v48 }
 0x190   : > { %v748_v23 = vpop.eup %747 }
 0x191   : > { %v371_v44 = vpack.c.bf16 %v360_v43, %v359_v41  ;;  %v750_v46 = vpop.eup %749  ;;  %v362_v50 = vmul.f32 %v748_v23, %v1080_v30  ;;  %v459_v41 = vld [vmem:[#allocation4] sm:$0xff] }
 0x192   : > { %v361_v49 = vmul.f32 %v750_v46, %v1083_v31 }
 0x194   : > { %v752_v26 = vpop.eup %751  ;;  %v372_v27 = vpack.c.bf16 %v362_v50, %v361_v49 }
 0x195   : > { %630 = vmatpush3.bf16.xpose.msra.mxu0 %v369_v15  ;;  %v754_v51 = vpop.eup %753  ;;  %v364_v53 = vmul.f32 %v752_v26, %v1090_v34  ;;  %v430_v34 = vstv %s615_s4 }
 0x196   : > { %631 = vmatprep.subr.bf16.mxu0 %v870_v42  ;;  %v363_v52 = vmul.f32 %v754_v51, %v1093_v35  ;;  %v421_v35 = vstv %s608_s16  ;;  %vm431_vm3 = vcmp.lt.s32.totalorder %v1026_v0, %v430_v34 }
 0x197   : > { %vm427_vm2 = vcmp.ge.s32.totalorder %v1026_v0, %v421_v35 }
 0x198   : > { %v756_v54 = vpop.eup %755  ;;  %v373_v55 = vpack.c.bf16 %v364_v53, %v363_v52  ;;  %vm1138_vm4 = vmand %vm427_vm2, %vm431_vm3 }
 0x199   : > { %v758_v31 = vpop.eup %757  ;;  %v366_v56 = vmul.f32 %v756_v54, %v1100_v38 }
 0x19a   : > { %v365_v30 = vmul.f32 %v758_v31, %v1103_v39  ;;  %v418_v39 = vlaneseq }
 0x19c   : > { %v374_v57 = vpack.c.bf16 %v366_v56, %v365_v30  ;;  %v419_v38 = vand.u32 127, %v418_v39 }
 0x19d   : > { %632 = vmatpush3.bf16.xpose.msra.mxu0 %v370_v32 }
 0x19e   : > { %633 = vmatprep.subr.bf16.mxu0 %v870_v42  ;;  %v422_v60 = vadd.s32 %v421_v35, %v419_v38 }
 0x1a5   : > { %634 = vmatpush3.bf16.xpose.msra.mxu0 %v371_v44 }
 0x1a6   : > { %635 = vmatprep.subr.bf16.mxu0 %v870_v42 }
 0x1ad   : > { %636 = vmatpush3.bf16.xpose.msra.mxu0 %v372_v27 }
 0x1ae   : > { %637 = vmatprep.subr.bf16.mxu0 %v870_v42 }
 0x1b5   : > { %638 = vmatpush3.bf16.xpose.msra.mxu0 %v373_v55 }
 0x1b6   : > { %639 = vmatprep.subr.bf16.mxu0 %v870_v42  ;;  %v425_v42 = vpop.permute.xlu0 %424 }
 0x1b7   : > { %vm426_vm5 = vcmp.eq.s32.totalorder %v422_v60, %v425_v42 }
 0x1bd   : > { %640 = vmatpush3.bf16.xpose.msra.mxu0 %v374_v57 }
 0x1c4   : > { %642 = vmatmul.mubr.bf16.vlgmr.msra.gmra.mrb[0].mxu0 %v375_v58 }
 0x297   : > { %v410_v61 = vpop.f32.mrb[0].mxu0 }
 0x298   : > { %v607_v62 = vclamps-f32 %v410_v61, 1.0  ;;  %v643_v63 = vpop.f32.mrb[1].mxu0 }
 0x299   : > { %v413_v1 = vpop.f32.mrb[2].mxu0 }
 0x29a   : > { %v644_v2 = vpop.f32.mrb[3].mxu0  ;;  %v433_v3 = vsel %vm426_vm5, %v607_v62, 0.0  ;;  %v450_v15 = vmul.f32 64.0, %v607_v62 }
 0x29b   : > { %434 = vadd.xlane.f32.xlu1 %v433_v3 }
 0x328   : > { %v435_v4 = vpop.xlane.xlu1 %434 }
 0x329   : > { %v436_v5 = vmul.f32 %v435_v4, %v435_v4  ;;  %v446_v14 = vmul.f32 0.87758255, %v435_v4 }
 0x32b   : > { %v437_v6 = vsub.f32 1.0, %v436_v5 }
 0x32d   : > { %v438_v7 = vmax.f32 %v437_v6, 0.0 }
 0x32f   : > { %759 = vrsqrt.f32 %v438_v7  ;;  %vm441_vm6 = vcmp.eq.f32.partialorder %v438_v7, inf  ;;  %v444_v10 = vand.u32 2147483648, %v438_v7  ;;  %vm443_vm7 = vcmp.eq.f32.partialorder %v438_v7, 0.0 }
 0x339   : > { %v760_v8 = vpop.eup %759 }
 0x33a   : > { %v440_v9 = vmul.f32 %v760_v8, %v438_v7 }
 0x33c   : > { %v442_v12 = vsel %vm441_vm6, %v438_v7, %v440_v9 }
 0x33d   : > { %v445_v13 = vsel %vm443_vm7, %v444_v10, %v442_v12 }
 0x33e   : > { %v447_v16 = vmul.f32 0.47942555, %v445_v13 }
 0x340   : > { %v448_v11 = vsub.f32 %v446_v14, %v447_v16 }
 0x342   : > { %v449_v20 = vmul.f32 64.0, %v448_v11 }
 0x344   : > { %v476_v21 = vsel %vm1138_vm4, %v449_v20, %v475_v17  ;;  %v451_v24 = vsel %vm426_vm5, %v449_v20, %v450_v15 }
 0x345   : > { %453 = vmax.xlane.f32.xlu1 %v451_v24  ;;  %477 = vst.msk [vmem:[#allocation5] sm:$0xff] %vm472_vm8, %v476_v21 }
 0x34c   : > { %v482_v45 = vld [vmem:[#allocation5] sm:$0xff] (!%p610_p10) }
 0x3d2   : > { %v454_v28 = vpop.xlane.xlu1 %453 }
 0x3d3   : > { %v455_v29 = vmax.f32 %v452_v25, %v454_v28 }
 0x3d5   : > { %v456_v18 = vsub.f32 %v452_v25, %v455_v29  ;;  %474 = vst.msk [vmem:[#allocation3] sm:$0xff] %vm472_vm8, %v455_v29  ;;  %463 = vperm.xlu1 %726, %v455_v29  }
 0x3d7   : > { %v457_v37 = vmul.f32 1.442695, %v456_v18 }
 0x3dc   : > { %v483_v46 = vld [vmem:[#allocation3] sm:$0xff] (!%p610_p10) }
 0x3dd   : > { %v484_v47 = vsub.f32 (!%p610_p10), %v482_v45, %v483_v46 }
 0x454   : > { %v464_v19 = vpop.permute.xlu1 %463 }
 0x455   : > { %v466_v32 = vsub.f32 %v451_v24, %v464_v19 }
 0x457   : > { %v467_v33 = vmul.f32 1.442695, %v466_v32 }
 0x459   : > { %761 = vpow2.f32 %v467_v33 }
 0x45a   : > { %763 = vpow2.f32 %v457_v37 }
 0x463   : > { %v762_v36 = vpop.eup %761 }
 0x464   : > { %469 = vadd.xlane.f32.xlu1 %v762_v36  ;;  %v764_v40 = vpop.eup %763 }
 0x465   : > { %v460_v43 = vmul.f32 %v764_v40, %v459_v41 }
 0x4ee   : > { %481 = sbr.rel (%p610_p10) target bundleno = 1297 (0x511), region = 44 }
 0x4f1   : > { %v470_v22 = vpop.xlane.xlu1 %469 }
 0x4f2   : > { %v471_v23 = vadd.f32 %v470_v22, %v460_v43 }
 0x4f4   : > { %473 = vst.msk [vmem:[#allocation4] sm:$0xff] %vm472_vm8, %v471_v23 }
 0x4fb   : > { %v485_v44 = vld [vmem:[#allocation4] sm:$0xff] }
 0x4fc   : > { %765 = vlog2.f32 %v485_v44 }
 0x506   : > { %v766_v48 = vpop.eup %765 }
 0x507   : > { %v487_v49 = vmul.f32 0.6931472, %v766_v48 }
 0x509   : > { %v488_v50 = vsub.f32 %v484_v47, %v487_v49 }
 0x50b   : > { %v490_v26 = vmax.f32 %v488_v50, -69.07755 }
 0x50d   : > { %v491_v27 = vsel %vm489_vm9, %v490_v26, -69.07755 }
 0x50e   : > { %v492_v51 = vsub.f32 0.0, %v491_v27 }
 0x510   : > { %493 = vst.msk [vmem:[%s235_s30] sm:$0xff] %vm472_vm8, %v492_v51 }
 0x511 PF: > { %s16_s19 = sadd.s32 1, %s863_s19   ;;  %s1190_s12 = smov %s839_s13 }
 0x512   : > { %p13_p6 = scmp.ge.s32.totalorder %s16_s19, 10   ;;  %s1191_s13 = smov %s843_s14 }
 0x513   : > { %s1192_s14 = smov %s951_s26  ;;  %s1193_s15 = smov %s855_s17 }
 0x514   : > { %s1194_s16 = smov %s859_s18  ;;  %s1195_s17 = smov %s1198_s21 }
 0x515   : > { %s1196_s18 = smov %s1202_s22  ;;  %15 = sbr.rel (!%p13_p6) target bundleno = 5 (0x5), region = 86 }
 0x51c   :  { %513 = vsyncpa [#allocation7], 1 }
 0x51d   :  { %515 = vsyncpa [#allocation7 + $0x1], 1 }

</bundles_post_ra>
